<compile_context>
chip_gen: v7x
topology: tpu7x:2x2x1
jax: 0.10.0
libtpu: 0.0.40
codegen_flags: <defaults>
</compile_context>

<pallas_src>
import jax
import jax.numpy as jnp
from jax.experimental import pallas as pl
from jax.experimental.pallas import tpu as pltpu


LANE = 128  # TPU lane width; out-feature axis is padded to a multiple of this.


def _round_up(x, m):
    return (x + m - 1) // m * m


# ----------------------------- Pallas kernel -------------------------------
def _make_fused_kernel(n_feat):
    """Kernel computing one (B, tn) output tile:  o = sum_f x_f @ wt_f + b."""

    def kernel(*refs):
        x_refs = refs[:n_feat]                 # each (B, d_f)
        wt_refs = refs[n_feat:2 * n_feat]      # each (d_f, tn)
        b_ref = refs[2 * n_feat]               # (1, tn)
        o_ref = refs[2 * n_feat + 1]           # (B, tn)

        acc = jnp.dot(x_refs[0][...], wt_refs[0][...],
                      preferred_element_type=jnp.float32)
        for xr, wr in zip(x_refs[1:], wt_refs[1:]):
            acc = acc + jnp.dot(xr[...], wr[...],
                                preferred_element_type=jnp.float32)
        # Bias added exactly once per output tile.
        o_ref[...] = (acc + b_ref[...]).astype(o_ref.dtype)

    return kernel


def fused_tower_linear(xs, wt_blocks, bias_pad, *, tn=LANE):
    """y_pad = concat(xs, axis=1) @ W^T (lane-padded) + b_pad.

    xs:         list of (B, d_f) activations (the per-feature embeddings).
    wt_blocks:  list of (d_f, N_pad) pre-transposed, pre-padded weight blocks.
    bias_pad:   (1, N_pad) padded bias.
    Returns (B, N_pad); caller slices to (B, F).
    """
    B = int(xs[0].shape[0])
    n_pad = int(bias_pad.shape[1])
    assert n_pad % tn == 0
    n_feat = len(xs)
    f_in = sum(int(x.shape[1]) for x in xs)

    in_specs = []
    # Per-feature activations: full (B, d_f) block, reused for every N tile.
    for x in xs:
        d = int(x.shape[1])
        in_specs.append(pl.BlockSpec((B, d), lambda j: (0, 0)))
    # Per-feature transposed weight blocks: column tile j of width tn.
    for w in wt_blocks:
        d = int(w.shape[0])
        in_specs.append(pl.BlockSpec((d, tn), lambda j: (0, j)))
    # Bias: column tile j.
    in_specs.append(pl.BlockSpec((1, tn), lambda j: (0, j)))

    cost = pl.CostEstimate(
        flops=2 * B * f_in * n_pad,
        bytes_accessed=4 * (B * f_in + f_in * n_pad + n_pad + B * n_pad),
        transcendentals=0,
    )

    return pl.pallas_call(
        _make_fused_kernel(n_feat),
        out_shape=jax.ShapeDtypeStruct((B, n_pad), xs[0].dtype),
        grid=(n_pad // tn,),
        in_specs=in_specs,
        out_specs=pl.BlockSpec((B, tn), lambda j: (0, j)),
        compiler_params=pltpu.CompilerParams(
            dimension_semantics=("parallel",)),
        cost_estimate=cost,
    )(*xs, *wt_blocks, bias_pad)


# ----------------------- TestTowerInteraction wrapper ----------------------
class TowerInteractionPallas:
    """
    Mirrors TestTowerInteraction:
      - `tables` is a list of (embedding_dim, [feature_names]) configs
      - in_features = sum(embedding_dim * len(feature_names))
      - forward: concat per-feature embeddings along dim=1, apply Linear.
    """

    def __init__(self, tables, key):
        self.features = [f for (_dim, feats) in tables for f in feats]
        self.feat_dims = [dim for (dim, feats) in tables for _f in feats]
        self.in_features = sum(self.feat_dims)

        kw, kb = jax.random.split(key)
        # Deterministic init matching nn.Linear's uniform(-1/sqrt(fan_in), ...)
        bound = 1.0 / (self.in_features ** 0.5)
        self.weight = jax.random.uniform(
            kw, (self.in_features, self.in_features),
            minval=-bound, maxval=bound, dtype=jnp.float32)
        self.bias = jax.random.uniform(
            kb, (self.in_features,), minval=-bound, maxval=bound,
            dtype=jnp.float32)

        # One-time layout preprocessing (NOT repeated per forward):
        #   split W column-wise per feature, transpose each block, and
        #   zero-pad the out-feature (lane) axis to a multiple of 128.
        self.n_pad = _round_up(self.in_features, LANE)
        pad_n = self.n_pad - self.in_features
        wt_blocks = []
        off = 0
        for d in self.feat_dims:
            blk = self.weight[:, off:off + d].T            # (d, F_out)
            blk = jnp.pad(blk, ((0, 0), (0, pad_n)))       # (d, N_pad)
            wt_blocks.append(blk)
            off += d
        self.wt_blocks = [jax.block_until_ready(b) for b in wt_blocks]
        self.bias_pad = jax.block_until_ready(
            jnp.pad(self.bias, (0, pad_n)).reshape(1, self.n_pad))

    def __call__(self, sparse):
        # sparse: dict feature_name -> (batch, embedding_dim) array
        xs = [sparse[f] for f in self.features]
        out_pad = fused_tower_linear(xs, self.wt_blocks, self.bias_pad)
        return out_pad[:, :self.in_features]


# --------------------------------- main -------------------------------------
if __name__ == "__main__":
    key = jax.random.PRNGKey(0)
    k_model, k_data = jax.random.split(key)

    # Small table configs consistent with the module:
    #   table0: embedding_dim=16, features ["feature_0", "feature_1"]
    #   table1: embedding_dim=32, features ["feature_2"]
    # in_features = 16*2 + 32 = 64
    tables = [
        (16, ["feature_0", "feature_1"]),
        (32, ["feature_2"]),
    ]
    batch = 8

    model = TowerInteractionPallas(tables, k_model)

    # Build the KeyedTensor-like dict of pooled embeddings.
    sparse = {}
    for dim, feats in tables:
        for f in feats:
            k_data, sub = jax.random.split(k_data)
            sparse[f] = jax.random.normal(sub, (batch, dim), dtype=jnp.float32)

    out = model(sparse)
    out = jax.block_until_ready(out)

    # Pure-JAX reference check.
    cat = jnp.concatenate([sparse[f] for f in model.features], axis=1)
    ref = cat @ model.weight.T + model.bias
    assert out.shape == (batch, model.in_features)
    assert jnp.allclose(out, ref, atol=1e-4, rtol=1e-4), (
        float(jnp.max(jnp.abs(out - ref))))

    print("KERNEL_OK")
</pallas_src>

<mosaic_0001>
module attributes {stable_mosaic.version = 11 : i64} {
  func.func @kernel(%arg0: i32, %arg1: memref<8x16xf32, #tpu.memory_space<vmem>>, %arg2: memref<8x16xf32, #tpu.memory_space<vmem>>, %arg3: memref<8x32xf32, #tpu.memory_space<vmem>>, %arg4: memref<16x128xf32, #tpu.memory_space<vmem>>, %arg5: memref<16x128xf32, #tpu.memory_space<vmem>>, %arg6: memref<32x128xf32, #tpu.memory_space<vmem>>, %arg7: memref<1x128xf32, #tpu.memory_space<vmem>>, %arg8: memref<8x128xf32, #tpu.memory_space<vmem>>) attributes {dimension_semantics = [#tpu.dimension_semantics<parallel>], iteration_bounds = array<i64: 1>, scalar_prefetch = 0 : i64, scratch_operands = 0 : i64, tpu.core_type = #tpu.core_type<tc>, window_params = [{pipeline_mode = #tpu.pipeline_mode<synchronous>, transform_indices = @transform_0, window_bounds = array<i64: 8, 16>}, {pipeline_mode = #tpu.pipeline_mode<synchronous>, transform_indices = @transform_1, window_bounds = array<i64: 8, 16>}, {pipeline_mode = #tpu.pipeline_mode<synchronous>, transform_indices = @transform_2, window_bounds = array<i64: 8, 32>}, {transform_indices = @transform_3, window_bounds = array<i64: 16, 128>}, {transform_indices = @transform_4, window_bounds = array<i64: 16, 128>}, {transform_indices = @transform_5, window_bounds = array<i64: 32, 128>}, {transform_indices = @transform_6, window_bounds = array<i64: 1, 128>}, {transform_indices = @transform_7, window_bounds = array<i64: 8, 128>}]} {
    %c0 = arith.constant 0 : index
    %c0_0 = arith.constant 0 : index
    %0 = vector.load %arg1[%c0, %c0_0] : memref<8x16xf32, #tpu.memory_space<vmem>>, vector<8x16xf32>
    %c0_1 = arith.constant 0 : index
    %c0_2 = arith.constant 0 : index
    %1 = vector.load %arg4[%c0_1, %c0_2] : memref<16x128xf32, #tpu.memory_space<vmem>>, vector<16x128xf32>
    %cst = arith.constant dense<0.000000e+00> : vector<8x128xf32>
    %2 = tpu.matmul %0, %1, %cst {dimension_numbers = #tpu.dot_dimension_numbers<[1], [0], [0], [1], [0, 0, 1, 1], [], []>} : vector<8x16xf32>, vector<16x128xf32>, vector<8x128xf32> -> vector<8x128xf32>
    %c0_3 = arith.constant 0 : index
    %c0_4 = arith.constant 0 : index
    %3 = vector.load %arg2[%c0_3, %c0_4] : memref<8x16xf32, #tpu.memory_space<vmem>>, vector<8x16xf32>
    %c0_5 = arith.constant 0 : index
    %c0_6 = arith.constant 0 : index
    %4 = vector.load %arg5[%c0_5, %c0_6] : memref<16x128xf32, #tpu.memory_space<vmem>>, vector<16x128xf32>
    %cst_7 = arith.constant dense<0.000000e+00> : vector<8x128xf32>
    %5 = tpu.matmul %3, %4, %cst_7 {dimension_numbers = #tpu.dot_dimension_numbers<[1], [0], [0], [1], [0, 0, 1, 1], [], []>} : vector<8x16xf32>, vector<16x128xf32>, vector<8x128xf32> -> vector<8x128xf32>
    %6 = arith.addf %2, %5 : vector<8x128xf32>
    %c0_8 = arith.constant 0 : index
    %c0_9 = arith.constant 0 : index
    %7 = vector.load %arg3[%c0_8, %c0_9] : memref<8x32xf32, #tpu.memory_space<vmem>>, vector<8x32xf32>
    %c0_10 = arith.constant 0 : index
    %c0_11 = arith.constant 0 : index
    %8 = vector.load %arg6[%c0_10, %c0_11] : memref<32x128xf32, #tpu.memory_space<vmem>>, vector<32x128xf32>
    %cst_12 = arith.constant dense<0.000000e+00> : vector<8x128xf32>
    %9 = tpu.matmul %7, %8, %cst_12 {dimension_numbers = #tpu.dot_dimension_numbers<[1], [0], [0], [1], [0, 0, 1, 1], [], []>} : vector<8x32xf32>, vector<32x128xf32>, vector<8x128xf32> -> vector<8x128xf32>
    %10 = arith.addf %6, %9 : vector<8x128xf32>
    %c0_13 = arith.constant 0 : index
    %c0_14 = arith.constant 0 : index
    %11 = vector.load %arg7[%c0_13, %c0_14] : memref<1x128xf32, #tpu.memory_space<vmem>>, vector<1x128xf32>
    %12 = vector.broadcast %11 : vector<1x128xf32> to vector<8x128xf32>
    %13 = arith.addf %10, %12 : vector<8x128xf32>
    %c0_15 = arith.constant 0 : index
    %c0_16 = arith.constant 0 : index
    %14 = vector.load %arg8[%c0_15, %c0_16] : memref<8x128xf32, #tpu.memory_space<vmem>>, vector<8x128xf32>
    tpu.vector_store %arg8[%c0_15, %c0_16], %13 {strides = array<i32>} : memref<8x128xf32, #tpu.memory_space<vmem>>, vector<8x128xf32>,
    return
  }
  func.func @transform_0(%arg0: i32) -> (i32, i32) {
    %c0_i32 = arith.constant 0 : i32
    %c0_i32_0 = arith.constant 0 : i32
    %c0_i32_1 = arith.constant 0 : i32
    return %c0_i32, %c0_i32_0 : i32, i32
  }
  func.func @transform_1(%arg0: i32) -> (i32, i32) {
    %c0_i32 = arith.constant 0 : i32
    %c0_i32_0 = arith.constant 0 : i32
    %c0_i32_1 = arith.constant 0 : i32
    return %c0_i32, %c0_i32_0 : i32, i32
  }
  func.func @transform_2(%arg0: i32) -> (i32, i32) {
    %c0_i32 = arith.constant 0 : i32
    %c0_i32_0 = arith.constant 0 : i32
    %c0_i32_1 = arith.constant 0 : i32
    return %c0_i32, %c0_i32_0 : i32, i32
  }
  func.func @transform_3(%arg0: i32) -> (i32, i32) {
    %c0_i32 = arith.constant 0 : i32
    %c0_i32_0 = arith.constant 0 : i32
    return %c0_i32, %arg0 : i32, i32
  }
  func.func @transform_4(%arg0: i32) -> (i32, i32) {
    %c0_i32 = arith.constant 0 : i32
    %c0_i32_0 = arith.constant 0 : i32
    return %c0_i32, %arg0 : i32, i32
  }
  func.func @transform_5(%arg0: i32) -> (i32, i32) {
    %c0_i32 = arith.constant 0 : i32
    %c0_i32_0 = arith.constant 0 : i32
    return %c0_i32, %arg0 : i32, i32
  }
  func.func @transform_6(%arg0: i32) -> (i32, i32) {
    %c0_i32 = arith.constant 0 : i32
    %c0_i32_0 = arith.constant 0 : i32
    return %c0_i32, %arg0 : i32, i32
  }
  func.func @transform_7(%arg0: i32) -> (i32, i32) {
    %c0_i32 = arith.constant 0 : i32
    %c0_i32_0 = arith.constant 0 : i32
    return %c0_i32, %arg0 : i32, i32
  }
}

</mosaic_0001>

<bundles_post_ra>
// kernel: tpu_custom_call.1
= control target key start
LH: loop header
LB: loop body
LE: loop exit
PB: predicated region body
PF: predicated region fallthrough
CT: control target
= control target key end

     0   :  { %12 = vsyncpa [#allocation3], 0  ;;  %s756_s0 = inlined_call_operand.hbm [shape: f32[8,16], index: 0, kind: input, shape index: {}]   ;;  %s757_s1 = inlined_call_operand.hbm [shape: f32[8,16], index: 1, kind: input, shape index: {}]   ;;  %s758_s2 = inlined_call_operand.hbm [shape: f32[8,32], index: 2, kind: input, shape index: {}]   ;;  %s759_s3 = inlined_call_operand.hbm [shape: f32[16,128], index: 3, kind: input, shape index: {}]   ;;  %s760_s4 = inlined_call_operand.hbm [shape: f32[16,128], index: 4, kind: input, shape index: {}]   ;;  %s761_s5 = inlined_call_operand.hbm [shape: f32[32,128], index: 5, kind: input, shape index: {}]   ;;  %s762_s6 = inlined_call_operand.vmem [shape: f32[1,128], index: 6, kind: input, shape index: {}]   ;;  %s763_s7 = inlined_call_operand.hbm [shape: f32[8,128], index: 7, kind: output, shape index: {}]  }
   0x1   :  { %13 = vsyncpa [#allocation6], 0 }
   0x2   :  { %14 = vsyncpa [#allocation9], 0 }
   0x3   :  { %15 = vsyncpa [#allocation12], 0 }
   0x4   :  { %16 = vsyncpa [#allocation4], 0  ;;  %s591_s24 = smov [#allocation5]   ;;  %s592_s26 = smov [#allocation8]  }
   0x5   :  { %s33_s25 = sshll.u32 %s591_s24, 4  ;;  %s52_s27 = sshll.u32 %s592_s26, 4  ;;  %s34_s25 = int_to_ptr.vmem [resolvable:$true] %s33_s25  ;;  %s643_s27 = int_to_ptr.vmem [resolvable:$true] %s52_s27 }
   0x6   :  { %s427_s30 = scalar_lea.hbm %s757_s1, 128 }
   0x7   :  { %p428_p0 = scmp.ne.s32.totalorder %s757_s1, %s427_s30  ;;  %p431_p1 = scmp.lt.u32.totalorder %s427_s30, %s757_s1 }
   0x9   :  { %p433_p2 = pnand %p431_p1, %p428_p0 }
   0xb   :  { %436 = shalt.err (!%p433_p2)
}
   0xc   :  { %s437_s12 = scalar_lea.vmem %s34_s25, 128  ;;  %p442_p4 = scmp.lt.s32.totalorder %s34_s25, %s34_s25 }
   0xd   :  { %p438_p3 = scmp.ne.s32.totalorder %s34_s25, %s437_s12  ;;  %p443_p5 = scmp.lt.s32.totalorder %s437_s12, %s437_s12 }
   0xf   :  { %p444_p6 = por %p443_p5, %p442_p4 }
  0x11   :  { %p445_p7 = pnand %p444_p6, %p438_p3 }
  0x13   :  { %448 = shalt.err (!%p445_p7)
}
  0x14   :  { %36 = dma.hbm_to_vmem [thread:$0]  %s757_s1, 128, %s34_s25, [#allocation6]  }
  0x15   :  { %s449_s17 = scalar_lea.hbm %s759_s3, 256 }
  0x16   :  { %p450_p8 = scmp.ne.s32.totalorder %s759_s3, %s449_s17  ;;  %p453_p9 = scmp.lt.u32.totalorder %s449_s17, %s759_s3 }
  0x18   :  { %p455_p10 = pnand %p453_p9, %p450_p8 }
  0x1a   :  { %458 = shalt.err (!%p455_p10)
}
  0x1b   :  { %s459_s22 = scalar_lea.vmem %s643_s27, 256  ;;  %p464_p12 = scmp.lt.s32.totalorder %s643_s27, %s643_s27 }
  0x1c   :  { %p460_p11 = scmp.ne.s32.totalorder %s643_s27, %s459_s22  ;;  %p465_p13 = scmp.lt.s32.totalorder %s459_s22, %s459_s22 }
  0x1e   :  { %p466_p0 = por %p465_p13, %p464_p12 }
  0x20   :  { %p467_p1 = pnand %p466_p0, %p460_p11 }
  0x22   :  { %470 = shalt.err (!%p467_p1)
}
  0x23   :  { %s593_s1 = smov 128   ;;  %s594_s23 = smov 8  }
  0x24   :  { %58 = dma.hbm_to_vmem [thread:$0]  %s759_s3, 256, %s643_s27, [#allocation9], %s593_s1, %s593_s1, %s594_s23  }
  0x25   :  { %s595_s26 = smov [#allocation2]   ;;  %s596_s29 = smov [#allocation7]  }
  0x26   :  { %s23_s28 = sshll.u32 %s595_s26, 4  ;;  %s43_s30 = sshll.u32 %s596_s29, 4  ;;  %s24_s28 = int_to_ptr.vmem [resolvable:$true] %s23_s28  ;;  %s44_s30 = int_to_ptr.vmem [resolvable:$true] %s43_s30 }
  0x27   :  { %s471_s10 = scalar_lea.hbm %s756_s0, 128 }
  0x28   :  { %p472_p2 = scmp.ne.s32.totalorder %s756_s0, %s471_s10  ;;  %p475_p3 = scmp.lt.u32.totalorder %s471_s10, %s756_s0 }
  0x2a   :  { %p477_p4 = pnand %p475_p3, %p472_p2 }
  0x2c   :  { %480 = shalt.err (!%p477_p4)
}
  0x2d   :  { %s481_s3 = scalar_lea.vmem %s24_s28, 128  ;;  %p486_p6 = scmp.lt.s32.totalorder %s24_s28, %s24_s28 }
  0x2e   :  { %p482_p5 = scmp.ne.s32.totalorder %s24_s28, %s481_s3  ;;  %p487_p7 = scmp.lt.s32.totalorder %s481_s3, %s481_s3 }
  0x30   :  { %p488_p8 = por %p487_p7, %p486_p6 }
  0x32   :  { %p489_p9 = pnand %p488_p8, %p482_p5 }
  0x34   :  { %492 = shalt.err (!%p489_p9)
}
  0x35   :  { %26 = dma.hbm_to_vmem [thread:$0]  %s756_s0, 128, %s24_s28, [#allocation3]  }
  0x36   :  { %s493_s18 = scalar_lea.hbm %s758_s2, 128 }
  0x37   :  { %p494_p10 = scmp.ne.s32.totalorder %s758_s2, %s493_s18  ;;  %p497_p11 = scmp.lt.u32.totalorder %s493_s18, %s758_s2 }
  0x39   :  { %p499_p12 = pnand %p497_p11, %p494_p10 }
  0x3b   :  { %502 = shalt.err (!%p499_p12)
}
  0x3c   :  { %s503_s24 = scalar_lea.vmem %s44_s30, 128  ;;  %p508_p0 = scmp.lt.s32.totalorder %s44_s30, %s44_s30 }
  0x3d   :  { %p504_p13 = scmp.ne.s32.totalorder %s44_s30, %s503_s24  ;;  %p509_p1 = scmp.lt.s32.totalorder %s503_s24, %s503_s24 }
  0x3f   :  { %p510_p2 = por %p509_p1, %p508_p0 }
  0x41   :  { %p511_p3 = pnand %p510_p2, %p504_p13 }
  0x43   :  { %514 = shalt.err (!%p511_p3)
}
  0x44   :  { %46 = dma.hbm_to_vmem [thread:$0]  %s758_s2, 128, %s44_s30, [#allocation6]  }
  0x45   :  { %s597_s26 = smov [#allocation10]   ;;  %s598_s29 = smov [#allocation11]  }
  0x46   :  { %s64_s28 = sshll.u32 %s597_s26, 4  ;;  %s76_s8 = sshll.u32 %s598_s29, 4  ;;  %s65_s28 = int_to_ptr.vmem [resolvable:$true] %s64_s28  ;;  %s701_s8 = int_to_ptr.vmem [resolvable:$true] %s76_s8 }
  0x47   :  { %s515_s11 = scalar_lea.hbm %s760_s4, 256 }
  0x48   :  { %p516_p4 = scmp.ne.s32.totalorder %s760_s4, %s515_s11  ;;  %p519_p5 = scmp.lt.u32.totalorder %s515_s11, %s760_s4 }
  0x4a   :  { %p521_p6 = pnand %p519_p5, %p516_p4 }
  0x4c   :  { %524 = shalt.err (!%p521_p6)
}
  0x4d   :  { %s525_s2 = scalar_lea.vmem %s65_s28, 256  ;;  %p530_p8 = scmp.lt.s32.totalorder %s65_s28, %s65_s28 }
  0x4e   :  { %p526_p7 = scmp.ne.s32.totalorder %s65_s28, %s525_s2  ;;  %p531_p9 = scmp.lt.s32.totalorder %s525_s2, %s525_s2 }
  0x50   :  { %p532_p10 = por %p531_p9, %p530_p8 }
  0x52   :  { %p533_p11 = pnand %p532_p10, %p526_p7 }
  0x54   :  { %536 = shalt.err (!%p533_p11)
}
  0x55   :  { %70 = dma.hbm_to_vmem [thread:$0]  %s760_s4, 256, %s65_s28, [#allocation9], %s593_s1, %s593_s1, %s594_s23  }
  0x56   :  { %s537_s17 = scalar_lea.hbm %s761_s5, 512 }
  0x57   :  { %p538_p12 = scmp.ne.s32.totalorder %s761_s5, %s537_s17  ;;  %p541_p13 = scmp.lt.u32.totalorder %s537_s17, %s761_s5 }
  0x59   :  { %p543_p0 = pnand %p541_p13, %p538_p12 }
  0x5b   :  { %546 = shalt.err (!%p543_p0)
}
  0x5c   :  { %s547_s22 = scalar_lea.vmem %s701_s8, 512  ;;  %p552_p2 = scmp.lt.s32.totalorder %s701_s8, %s701_s8 }
  0x5d   :  { %p548_p1 = scmp.ne.s32.totalorder %s701_s8, %s547_s22  ;;  %p553_p3 = scmp.lt.s32.totalorder %s547_s22, %s547_s22 }
  0x5f   :  { %p554_p4 = por %p553_p3, %p552_p2 }
  0x61   :  { %p555_p5 = pnand %p554_p4, %p548_p1 }
  0x63   :  { %558 = shalt.err (!%p555_p5)
}
  0x64   :  { %82 = dma.hbm_to_vmem [thread:$0]  %s761_s5, 512, %s701_s8, [#allocation12], %s593_s1, %s593_s1, %s594_s23  }
  0x65   :  { %581 = dma.done.wait [#allocation3], 128  }
  0x66   :  { %582 = vsyncadd [#allocation3], 4294967168 }
  0x67   :  { %583 = dma.done.wait [#allocation6], 256  }
  0x68   :  { %584 = vsyncadd [#allocation6], 4294967040 }
  0x69   :  { %585 = dma.done.wait [#allocation9], 512  }
  0x6a   :  { %586 = vsyncadd [#allocation9], 4294966784 }
  0x6b   :  { %587 = dma.done.wait [#allocation12], 512  }
  0x6c   :  { %588 = vsyncadd [#allocation12], 4294966784  ;;  %v599_v0 = vmov 0.0|0.0   ;;  %vm600_vm0 = vmmov 0   ;;  %v601_v1 = vmov 0.0   ;;  %v107_v2 = vld [vmem:[#allocation10] sm:$0xff] }
  0x6d   :  { %403 = vmatprep.subr.bf16.mxu1 %v599_v0  ;;  %409 = vmatprep.subr.bf16.mxu0 %v599_v0  ;;  %v108_v3 = vld [vmem:[#allocation10 + $0x8] sm:$0xff]  ;;  %v257_v4 = vld [vmem:[#allocation11] sm:$0xff]  ;;  %v258_v6 = vld [vmem:[#allocation11 + $0x8] sm:$0xff]  ;;  %vm109_vm1 = vcmask 130048   ;;  %vm261_vm2 = vcmask 261120   ;;  %s602_s23 = smov [#allocation13]  }
  0x6e   :  { %382 = vmatprep.mubr.msk.f32.mxu1 %vm600_vm0, %v601_v1  ;;  %400 = vmatprep.mubr.msk.f32.mxu0 %vm600_vm0, %v601_v1  ;;  %v404_v5 = vpack.c.bf16 %v108_v3, %v107_v2  ;;  %v104_v7 = vld [vmem:[#allocation8] sm:$0xff]  ;;  %v410_v8 = vpack.c.bf16 %v258_v6, %v257_v4  ;;  %v105_v9 = vld [vmem:[#allocation8 + $0x8] sm:$0xff]  ;;  %v259_v10 = vld [vmem:[#allocation11 + $0x10] sm:$0xff]  ;;  %s351_s0 = sshll.u32 %s602_s23, 4  ;;  %s352_s0 = int_to_ptr.vmem [resolvable:$true] %s351_s0 }
  0x6f   :  { %v260_v11 = vld [vmem:[#allocation11 + $0x18] sm:$0xff]  ;;  %v106_v12 = vld [vmem:[#allocation5] sm:$0xff]  ;;  %v407_v13 = vpack.c.bf16 %v105_v9, %v104_v7  ;;  %v103_v15 = vld [vmem:[#allocation2] sm:$0xff]  ;;  %s559_s25 = scalar_lea.vmem %s352_s0, 128  ;;  %p564_p7 = scmp.lt.s32.totalorder %s352_s0, %s352_s0 }
  0x70   :  { %405 = vmatpush3.bf16.msra.mxu1 %v404_v5  ;;  %411 = vmatpush3.bf16.msra.mxu0 %v410_v8  ;;  %v413_v14 = vpack.c.bf16 %v260_v11, %v259_v10  ;;  %v256_v16 = vld [vmem:[#allocation7] sm:$0xff]  ;;  %v366_v23 = vld [vmem:[%s762_s6] ss:$0 sm:$0xff]  ;;  %p560_p6 = scmp.ne.s32.totalorder %s352_s0, %s559_s25  ;;  %p565_p8 = scmp.lt.s32.totalorder %s559_s25, %s559_s25 }
  0x71   :  { %406 = vmatprep.subr.bf16.mxu1 %v599_v0  ;;  %412 = vmatprep.subr.bf16.mxu0 %v599_v0 }
  0x72   :  { %p566_p9 = por %p565_p8, %p564_p7 }
  0x73   :  { %383 = vmatmul.mubr.msk.f32.vlgmr.msra.gmra.mrb[0].mxu1 %vm109_vm1, %v106_v12 }
  0x74   :  { %408 = vmatpush3.bf16.msra.mxu1 %v407_v13  ;;  %389 = vmatprep.mubr.msk.f32.mxu1 %vm600_vm0, %v601_v1  ;;  %p567_p10 = pnand %p566_p9, %p560_p6 }
  0x75   :  { %414 = vmatpush3.bf16.msra.mxu0 %v413_v14 }
  0x77   :  { %390 = vmatmul.mubr.msk.f32.vlgmr.msra.gmra.mrb[2].mxu1 %vm109_vm1, %v103_v15 }
  0x78   :  { %401 = vmatmul.mubr.msk.f32.vlgmr.msra.gmra.mrb[0].mxu0 %vm261_vm2, %v256_v16 }
 0x146   :  { %v179_v17 = vpop.f32.mrb[0].mxu1 }
 0x147   :  { %v384_v18 = vpop.f32.mrb[1].mxu1 }
 0x14a   :  { %v252_v19 = vpop.f32.mrb[2].mxu1 }
 0x14b   :  { %v253_v20 = vadd.f32 %v252_v19, %v179_v17  ;;  %v391_v21 = vpop.f32.mrb[3].mxu1  ;;  %v331_v22 = vpop.f32.mrb[0].mxu0 }
 0x14c   :  { %v402_v24 = vpop.f32.mrb[1].mxu0 }
 0x14d   :  { %v335_v25 = vadd.f32 %v331_v22, %v253_v20 }
 0x14f   :  { %v343_v26 = vadd.f32 %v366_v23, %v335_v25 }
 0x151   :  { %344 = vst [vmem:[#allocation13] sm:$0xff] %v343_v26 }
 0x152   :  { %570 = shalt.err (!%p567_p10)
}
 0x153   :  { %s571_s29 = scalar_lea.hbm %s763_s7, 128 }
 0x154   :  { %p572_p11 = scmp.ne.s32.totalorder %s763_s7, %s571_s29  ;;  %p575_p12 = scmp.lt.u32.totalorder %s571_s29, %s763_s7 }
 0x156   :  { %p577_p13 = pnand %p575_p12, %p572_p11 }
 0x158   :  { %580 = shalt.err (!%p577_p13)
}
 0x159   :  { %354 = dma.vmem_to_hbm [thread:$0]  %s352_s0, 128, %s763_s7, [#allocation4]  }
 0x15a   :  { %589 = dma.done.wait [#allocation4], 128  }
 0x15b   :  { %590 = vsyncadd [#allocation4], 4294967168 }
 0x15c   :  { %358 = vsyncpa [#allocation3], 1 }
 0x15d   :  { %359 = vsyncpa [#allocation6], 1 }
 0x15e   :  { %360 = vsyncpa [#allocation9], 1 }
 0x15f   :  { %361 = vsyncpa [#allocation12], 1 }
 0x160   :  { %362 = vsyncpa [#allocation4], 1 }

</bundles_post_ra>
